<compile_context>
chip_gen: v6e
topology: v6e:2x2x1
jax: 0.10.0
libtpu: 0.0.40
codegen_flags: <defaults>
</compile_context>

<pallas_src>
import functools

import jax
import jax.numpy as jnp
from jax import lax
from jax.experimental import pallas as pl
from jax.experimental.pallas import tpu as pltpu


def _head_kernel(x_ref, wk_ref, wq_ref, wv_ref, o_ref, *, B, T, H, scale):
    # x_ref : (B*T, C)   o_ref : (B*T, H)   w*_ref : (C, H)
    x = x_ref[...]                                                     # (B*T, C)

    # Three projection matmuls, hoisted out of the batch loop. Each result
    # lands on its own tile, so the per-batch split below is a free
    # sublane-aligned row slice (no 16-lane column extraction).
    k_all = jnp.dot(x, wk_ref[...], preferred_element_type=jnp.float32)  # (B*T, H)
    q_all = jnp.dot(x, wq_ref[...], preferred_element_type=jnp.float32)  # (B*T, H)
    v_all = jnp.dot(x, wv_ref[...], preferred_element_type=jnp.float32)  # (B*T, H)

    # Causal mask, built once (static in T). Finite fill avoids -inf handling.
    row = lax.broadcasted_iota(jnp.int32, (T, T), 0)
    col = lax.broadcasted_iota(jnp.int32, (T, T), 1)
    causal = col <= row
    neg_fill = jnp.float32(-1e30)

    for b in range(B):                       # static unroll over the tiny batch
        s = b * T                            # T == 8 -> sublane-tile aligned
        k = k_all[s:s + T]                   # (T, H) static row slices
        q = q_all[s:s + T]
        v = v_all[s:s + T]

        # q @ k^T via dot_general (contract last dims) -> no explicit transpose.
        att = lax.dot_general(
            q, k,
            dimension_numbers=(((1,), (1,)), ((), ())),
            preferred_element_type=jnp.float32) * scale                # (T, T)

        att = jnp.where(causal, att, neg_fill)

        # Numerically-stable softmax along the last axis (exact divide).
        m = jnp.max(att, axis=-1, keepdims=True)
        e = jnp.exp(att - m)
        p = e / jnp.sum(e, axis=-1, keepdims=True)

        # Dropout on attention probs: identity (eval mode).

        out = jnp.dot(p, v, preferred_element_type=jnp.float32)       # (T, H)
        o_ref[s:s + T, :] = out.astype(o_ref.dtype)                    # direct store


def head_forward(x, w_key, w_query, w_value):
    """x: (B, T, C) f32; w_*: (C, H) f32 (transposed nn.Linear weights)."""
    B, T, C = x.shape
    H = w_key.shape[1]
    scale = float(H) ** -0.5

    # Flatten batch*seq so the kernel sees a plain 2-D operand (free in XLA).
    x2d = x.reshape(B * T, C)

    kernel = functools.partial(_head_kernel, B=B, T=T, H=H, scale=scale)

    out_flat = pl.pallas_call(
        kernel,
        out_shape=jax.ShapeDtypeStruct((B * T, H), x.dtype),
        grid=(1,),
        in_specs=[
            pl.BlockSpec((B * T, C), lambda i: (0, 0)),
            pl.BlockSpec((C, H), lambda i: (0, 0)),
            pl.BlockSpec((C, H), lambda i: (0, 0)),
            pl.BlockSpec((C, H), lambda i: (0, 0)),
        ],
        out_specs=pl.BlockSpec((B * T, H), lambda i: (0, 0)),
        compiler_params=pltpu.CompilerParams(
            dimension_semantics=("arbitrary",)),
    )(x2d, w_key, w_query, w_value)

    return out_flat.reshape(B, T, H)


def head_reference(x, w_key, w_query, w_value):
    """Pure-JAX reference matching the PyTorch forward (eval mode)."""
    H = w_key.shape[1]
    k = x @ w_key
    q = x @ w_query
    v = x @ w_value
    att = (q @ jnp.swapaxes(k, -2, -1)) * (H ** -0.5)
    T = x.shape[1]
    tril = jnp.tril(jnp.ones((T, T), dtype=bool))
    att = jnp.where(tril, att, -jnp.inf)
    att = jax.nn.softmax(att, axis=-1)
    return att @ v


if __name__ == "__main__":
    # Small shapes consistent with the module: block_size (seq) = 8,
    # n_embed = 32, head_size = 16, batch = 2.
    B, T, C, H = 2, 8, 32, 16

    key = jax.random.PRNGKey(0)
    kx, kk, kq, kv = jax.random.split(key, 4)

    x = jax.random.normal(kx, (B, T, C), dtype=jnp.float32)
    # Deterministic init of nn.Linear(n_embed, head_size, bias=False) weights,
    # stored transposed as (C, H) so forward is x @ W.
    w_key = jax.random.normal(kk, (C, H), dtype=jnp.float32) * 0.02
    w_query = jax.random.normal(kq, (C, H), dtype=jnp.float32) * 0.02
    w_value = jax.random.normal(kv, (C, H), dtype=jnp.float32) * 0.02

    out = head_forward(x, w_key, w_query, w_value)
    out = jax.block_until_ready(out)

    ref = head_reference(x, w_key, w_query, w_value)
    assert out.shape == (B, T, H)
    # Exact softmax divide (no approx reciprocal) -> tighter tolerance than before.
    assert jnp.allclose(out, ref, atol=1e-3, rtol=1e-3), "mismatch vs reference"

    print("KERNEL_OK")
</pallas_src>

<mosaic_0001>
module attributes {stable_mosaic.version = 11 : i64} {
  func.func @_head_kernel(%arg0: i32, %arg1: memref<16x32xf32, #tpu.memory_space<vmem>>, %arg2: memref<32x16xf32, #tpu.memory_space<vmem>>, %arg3: memref<32x16xf32, #tpu.memory_space<vmem>>, %arg4: memref<32x16xf32, #tpu.memory_space<vmem>>, %arg5: memref<16x16xf32, #tpu.memory_space<vmem>>) attributes {dimension_semantics = [#tpu.dimension_semantics<arbitrary>], iteration_bounds = array<i64: 1>, scalar_prefetch = 0 : i64, scratch_operands = 0 : i64, tpu.core_type = #tpu.core_type<tc>, window_params = [{pipeline_mode = #tpu.pipeline_mode<synchronous>, transform_indices = @transform_0, window_bounds = array<i64: 16, 32>}, {pipeline_mode = #tpu.pipeline_mode<synchronous>, transform_indices = @transform_1, window_bounds = array<i64: 32, 16>}, {pipeline_mode = #tpu.pipeline_mode<synchronous>, transform_indices = @transform_2, window_bounds = array<i64: 32, 16>}, {pipeline_mode = #tpu.pipeline_mode<synchronous>, transform_indices = @transform_3, window_bounds = array<i64: 32, 16>}, {pipeline_mode = #tpu.pipeline_mode<synchronous>, transform_indices = @transform_4, window_bounds = array<i64: 16, 16>}]} {
    %c0 = arith.constant 0 : index
    %c0_0 = arith.constant 0 : index
    %0 = vector.load %arg1[%c0, %c0_0] : memref<16x32xf32, #tpu.memory_space<vmem>>, vector<16x32xf32>
    %c0_1 = arith.constant 0 : index
    %c0_2 = arith.constant 0 : index
    %1 = vector.load %arg2[%c0_1, %c0_2] : memref<32x16xf32, #tpu.memory_space<vmem>>, vector<32x16xf32>
    %cst = arith.constant dense<0.000000e+00> : vector<16x16xf32>
    %2 = tpu.matmul %0, %1, %cst {dimension_numbers = #tpu.dot_dimension_numbers<[1], [0], [0], [1], [0, 0, 1, 1], [], []>} : vector<16x32xf32>, vector<32x16xf32>, vector<16x16xf32> -> vector<16x16xf32>
    %c0_3 = arith.constant 0 : index
    %c0_4 = arith.constant 0 : index
    %3 = vector.load %arg3[%c0_3, %c0_4] : memref<32x16xf32, #tpu.memory_space<vmem>>, vector<32x16xf32>
    %cst_5 = arith.constant dense<0.000000e+00> : vector<16x16xf32>
    %4 = tpu.matmul %0, %3, %cst_5 {dimension_numbers = #tpu.dot_dimension_numbers<[1], [0], [0], [1], [0, 0, 1, 1], [], []>} : vector<16x32xf32>, vector<32x16xf32>, vector<16x16xf32> -> vector<16x16xf32>
    %c0_6 = arith.constant 0 : index
    %c0_7 = arith.constant 0 : index
    %5 = vector.load %arg4[%c0_6, %c0_7] : memref<32x16xf32, #tpu.memory_space<vmem>>, vector<32x16xf32>
    %cst_8 = arith.constant dense<0.000000e+00> : vector<16x16xf32>
    %6 = tpu.matmul %0, %5, %cst_8 {dimension_numbers = #tpu.dot_dimension_numbers<[1], [0], [0], [1], [0, 0, 1, 1], [], []>} : vector<16x32xf32>, vector<32x16xf32>, vector<16x16xf32> -> vector<16x16xf32>
    %7 = tpu.iota {dimensions = array<i32: 0>} : vector<8x8xi32>
    %8 = tpu.iota {dimensions = array<i32: 1>} : vector<8x8xi32>
    %9 = arith.cmpi sle, %8, %7 : vector<8x8xi32>
    %10 = vector.extract_strided_slice %2 {offsets = [0, 0], sizes = [8, 16], strides = [1, 1]} : vector<16x16xf32> to vector<8x16xf32>
    %11 = vector.extract_strided_slice %4 {offsets = [0, 0], sizes = [8, 16], strides = [1, 1]} : vector<16x16xf32> to vector<8x16xf32>
    %12 = vector.extract_strided_slice %6 {offsets = [0, 0], sizes = [8, 16], strides = [1, 1]} : vector<16x16xf32> to vector<8x16xf32>
    %cst_9 = arith.constant dense<0.000000e+00> : vector<8x8xf32>
    %13 = tpu.matmul %11, %10, %cst_9 {dimension_numbers = #tpu.dot_dimension_numbers<[1], [1], [0], [0], [0, 0, 1, 0], [], []>} : vector<8x16xf32>, vector<8x16xf32>, vector<8x8xf32> -> vector<8x8xf32>
    %cst_10 = arith.constant 2.500000e-01 : f32
    %14 = vector.broadcast %cst_10 : f32 to vector<8x8xf32>
    %15 = arith.mulf %13, %14 : vector<8x8xf32>
    %cst_11 = arith.constant -1.000000e+30 : f32
    %16 = vector.broadcast %cst_11 : f32 to vector<8x8xf32>
    %17 = arith.select %9, %15, %16 : vector<8x8xi1>, vector<8x8xf32>
    %cst_12 = arith.constant dense<0xFF800000> : vector<8xf32>
    %18 = vector.multi_reduction <maximumf>, %17, %cst_12 [1] : vector<8x8xf32> to vector<8xf32>
    %19 = vector.shape_cast %18 : vector<8xf32> to vector<8x1xf32>
    %20 = vector.broadcast %19 : vector<8x1xf32> to vector<8x8xf32>
    %21 = arith.subf %17, %20 : vector<8x8xf32>
    %22 = math.exp %21 : vector<8x8xf32>
    %cst_13 = arith.constant dense<0.000000e+00> : vector<8xf32>
    %23 = vector.multi_reduction <add>, %22, %cst_13 [1] : vector<8x8xf32> to vector<8xf32>
    %24 = vector.shape_cast %23 : vector<8xf32> to vector<8x1xf32>
    %25 = vector.broadcast %24 : vector<8x1xf32> to vector<8x8xf32>
    %26 = arith.divf %22, %25 : vector<8x8xf32>
    %cst_14 = arith.constant dense<0.000000e+00> : vector<8x16xf32>
    %27 = tpu.matmul %26, %12, %cst_14 {dimension_numbers = #tpu.dot_dimension_numbers<[1], [0], [0], [1], [0, 0, 1, 1], [], []>} : vector<8x8xf32>, vector<8x16xf32>, vector<8x16xf32> -> vector<8x16xf32>
    %c0_15 = arith.constant 0 : index
    %c0_16 = arith.constant 0 : index
    %28 = vector.load %arg5[%c0_15, %c0_16] : memref<16x16xf32, #tpu.memory_space<vmem>>, vector<8x16xf32>
    tpu.vector_store %arg5[%c0_15, %c0_16], %27 {strides = array<i32>} : memref<16x16xf32, #tpu.memory_space<vmem>>, vector<8x16xf32>,
    %29 = vector.extract_strided_slice %2 {offsets = [8, 0], sizes = [8, 16], strides = [1, 1]} : vector<16x16xf32> to vector<8x16xf32>
    %30 = vector.extract_strided_slice %4 {offsets = [8, 0], sizes = [8, 16], strides = [1, 1]} : vector<16x16xf32> to vector<8x16xf32>
    %31 = vector.extract_strided_slice %6 {offsets = [8, 0], sizes = [8, 16], strides = [1, 1]} : vector<16x16xf32> to vector<8x16xf32>
    %cst_17 = arith.constant dense<0.000000e+00> : vector<8x8xf32>
    %32 = tpu.matmul %30, %29, %cst_17 {dimension_numbers = #tpu.dot_dimension_numbers<[1], [1], [0], [0], [0, 0, 1, 0], [], []>} : vector<8x16xf32>, vector<8x16xf32>, vector<8x8xf32> -> vector<8x8xf32>
    %cst_18 = arith.constant 2.500000e-01 : f32
    %33 = vector.broadcast %cst_18 : f32 to vector<8x8xf32>
    %34 = arith.mulf %32, %33 : vector<8x8xf32>
    %cst_19 = arith.constant -1.000000e+30 : f32
    %35 = vector.broadcast %cst_19 : f32 to vector<8x8xf32>
    %36 = arith.select %9, %34, %35 : vector<8x8xi1>, vector<8x8xf32>
    %cst_20 = arith.constant dense<0xFF800000> : vector<8xf32>
    %37 = vector.multi_reduction <maximumf>, %36, %cst_20 [1] : vector<8x8xf32> to vector<8xf32>
    %38 = vector.shape_cast %37 : vector<8xf32> to vector<8x1xf32>
    %39 = vector.broadcast %38 : vector<8x1xf32> to vector<8x8xf32>
    %40 = arith.subf %36, %39 : vector<8x8xf32>
    %41 = math.exp %40 : vector<8x8xf32>
    %cst_21 = arith.constant dense<0.000000e+00> : vector<8xf32>
    %42 = vector.multi_reduction <add>, %41, %cst_21 [1] : vector<8x8xf32> to vector<8xf32>
    %43 = vector.shape_cast %42 : vector<8xf32> to vector<8x1xf32>
    %44 = vector.broadcast %43 : vector<8x1xf32> to vector<8x8xf32>
    %45 = arith.divf %41, %44 : vector<8x8xf32>
    %cst_22 = arith.constant dense<0.000000e+00> : vector<8x16xf32>
    %46 = tpu.matmul %45, %31, %cst_22 {dimension_numbers = #tpu.dot_dimension_numbers<[1], [0], [0], [1], [0, 0, 1, 1], [], []>} : vector<8x8xf32>, vector<8x16xf32>, vector<8x16xf32> -> vector<8x16xf32>
    %c8 = arith.constant 8 : index
    %c0_23 = arith.constant 0 : index
    %47 = vector.load %arg5[%c8, %c0_23] : memref<16x16xf32, #tpu.memory_space<vmem>>, vector<8x16xf32>
    tpu.vector_store %arg5[%c8, %c0_23], %46 {strides = array<i32>} : memref<16x16xf32, #tpu.memory_space<vmem>>, vector<8x16xf32>,
    return
  }
  func.func @transform_0(%arg0: i32) -> (i32, i32) {
    %c0_i32 = arith.constant 0 : i32
    %c0_i32_0 = arith.constant 0 : i32
    %c0_i32_1 = arith.constant 0 : i32
    return %c0_i32, %c0_i32_0 : i32, i32
  }
  func.func @transform_1(%arg0: i32) -> (i32, i32) {
    %c0_i32 = arith.constant 0 : i32
    %c0_i32_0 = arith.constant 0 : i32
    %c0_i32_1 = arith.constant 0 : i32
    return %c0_i32, %c0_i32_0 : i32, i32
  }
  func.func @transform_2(%arg0: i32) -> (i32, i32) {
    %c0_i32 = arith.constant 0 : i32
    %c0_i32_0 = arith.constant 0 : i32
    %c0_i32_1 = arith.constant 0 : i32
    return %c0_i32, %c0_i32_0 : i32, i32
  }
  func.func @transform_3(%arg0: i32) -> (i32, i32) {
    %c0_i32 = arith.constant 0 : i32
    %c0_i32_0 = arith.constant 0 : i32
    %c0_i32_1 = arith.constant 0 : i32
    return %c0_i32, %c0_i32_0 : i32, i32
  }
  func.func @transform_4(%arg0: i32) -> (i32, i32) {
    %c0_i32 = arith.constant 0 : i32
    %c0_i32_0 = arith.constant 0 : i32
    %c0_i32_1 = arith.constant 0 : i32
    return %c0_i32, %c0_i32_0 : i32, i32
  }
}

</mosaic_0001>

<bundles_post_ra>
// kernel: tpu_custom_call.1
= control target key start
LH: loop header
LB: loop body
LE: loop exit
PB: predicated region body
PF: predicated region fallthrough
CT: control target
= control target key end

     0   :  { %vm24_vm0 = vcmask 261120   ;;  %s836_s0 = inlined_call_operand.vmem [shape: f32[16,32], index: 0, kind: input, shape index: {}]   ;;  %s837_s1 = inlined_call_operand.vmem [shape: f32[32,16], index: 1, kind: input, shape index: {}]   ;;  %s838_s2 = inlined_call_operand.vmem [shape: f32[32,16], index: 2, kind: input, shape index: {}]   ;;  %s839_s3 = inlined_call_operand.vmem [shape: f32[32,16], index: 3, kind: input, shape index: {}]   ;;  %s840_s4 = inlined_call_operand.hbm [shape: f32[16,16], index: 4, kind: output, shape index: {}]  }
   0x1   :  { %v23_v0 = vld [vmem:[%s837_s1 + $0x18] sm:$0xff]  ;;  %v22_v1 = vld [vmem:[%s837_s1 + $0x10] sm:$0xff]  ;;  %v21_v4 = vld [vmem:[%s837_s1 + $0x8] sm:$0xff] }
   0x2   :  { %v109_v2 = vld [vmem:[%s838_s2 + $0x18] sm:$0xff]  ;;  %651 = vmatprep.subr.mxu0 %v23_v0  ;;  %v108_v3 = vld [vmem:[%s838_s2 + $0x10] sm:$0xff]  ;;  %v107_v5 = vld [vmem:[%s838_s2 + $0x8] sm:$0xff] }
   0x3   :  { %662 = vmatprep.subr.mxu1 %v109_v2  ;;  %652 = vmatpush3.msra.mxu0 %v23_v0  ;;  %v18_v6 = vld [vmem:[%s836_s0] sm:$0xff] }
   0x4   :  { %663 = vmatpush3.msra.mxu1 %v109_v2  ;;  %653 = vmatprep.subr.mxu0 %v22_v1  ;;  %v20_v7 = vld [vmem:[%s837_s1] sm:$0xff] }
   0x5   :  { %664 = vmatprep.subr.mxu1 %v108_v3  ;;  %654 = vmatpush3.msra.mxu0 %v22_v1 }
   0x6   :  { %665 = vmatpush3.msra.mxu1 %v108_v3 }
   0x7   :  { %9 = vsyncpa [#allocation3], 0  ;;  %655 = vmatprep.subr.mxu0 %v21_v4  ;;  %666 = vmatprep.subr.mxu1 %v107_v5  ;;  %v106_v8 = vld [vmem:[%s838_s2] sm:$0xff]  ;;  %v19_v9 = vld [vmem:[%s836_s0 + $0x8] sm:$0xff]  ;;  %v739_v14 = vmov 0.0   ;;  %vm740_vm1 = vmmov 0   ;;  %v264_v21 = vlaneseq }
   0x8   :  { %656 = vmatpush3.msra.mxu0 %v21_v4  ;;  %659 = vmatprep.mubr.msk.f32.mxu0 %vm24_vm0, %v18_v6  ;;  %v188_v10 = vld [vmem:[%s839_s3 + $0x18] sm:$0xff]  ;;  %v187_v11 = vld [vmem:[%s839_s3 + $0x10] sm:$0xff]  ;;  %v186_v12 = vld [vmem:[%s839_s3 + $0x8] sm:$0xff]  ;;  %vm269_vm2 = vcmask 130048   ;;  %vm348_vm4 = vcmask 64512  }
   0x9   :  { %657 = vmatprep.subr.mxu0 %v20_v7  ;;  %667 = vmatpush3.msra.mxu1 %v107_v5  ;;  %v185_v13 = vld [vmem:[%s839_s3] sm:$0xff]  ;;  %v265_v23 = vshrl.u32 %v264_v21, 7  ;;  %v267_v24 = vand.u32 127, %v264_v21  ;;  %s741_s3 = smov [#allocation2]  }
   0xa   :  { %658 = vmatpush3.msra.mxu0 %v20_v7  ;;  %668 = vmatprep.subr.mxu1 %v106_v8  ;;  %s602_s14 = sshll.u32 %s741_s3, 4  ;;  %s603_s14 = int_to_ptr.vmem [resolvable:$true] %s602_s14 }
   0xb   :  { %660 = vmatmul.mubr.msk.f32.vlgmr.msra.gmra.mxu0 %vm24_vm0, %v19_v9  ;;  %669 = vmatpush3.msra.mxu1 %v106_v8  ;;  %vm268_vm3 = vcmp.le.s32.totalorder %v267_v24, %v265_v23  ;;  %s717_s15 = scalar_lea.vmem %s603_s14, 256  ;;  %p722_p1 = scmp.lt.s32.totalorder %s603_s14, %s603_s14 }
   0xc   :  { %670 = vmatprep.mubr.msk.f32.mxu1 %vm24_vm0, %v18_v6  ;;  %673 = vmatprep.subr.mxu0 %v188_v10  ;;  %p718_p0 = scmp.ne.s32.totalorder %s603_s14, %s717_s15  ;;  %p723_p2 = scmp.lt.s32.totalorder %s717_s15, %s717_s15 }
   0xd   :  { %671 = vmatmul.mubr.msk.f32.vlgmr.msra.gmra.mxu1 %vm24_vm0, %v19_v9  ;;  %674 = vmatpush3.msra.mxu0 %v188_v10 }
   0xe   :  { %675 = vmatprep.subr.mxu0 %v187_v11  ;;  %681 = vmatprep.mubr.msk.f32.mxu0 %vm24_vm0, %v18_v6  ;;  %p724_p3 = por %p723_p2, %p722_p1 }
   0xf   :  { %676 = vmatpush3.msra.mxu0 %v187_v11  ;;  %684 = vmatprep.subr.mxu1 %v739_v14 }
  0x10   :  { %677 = vmatprep.subr.mxu0 %v186_v12  ;;  %686 = vmatprep.mubr.msk.f32.mxu1 %vm740_vm1, %v739_v14  ;;  %p725_p4 = pnand %p724_p3, %p718_p0 }
  0x11   :  { %678 = vmatpush3.msra.mxu0 %v186_v12 }
  0x12   :  { %679 = vmatprep.subr.mxu0 %v185_v13 }
  0x13   :  { %680 = vmatpush3.msra.mxu0 %v185_v13 }
  0x14   :  { %682 = vmatmul.mubr.msk.f32.vlgmr.msra.gmra.mxu0 %vm24_vm0, %v19_v9  ;;  %694 = vmatprep.subr.mxu0 %v739_v14 }
  0x15   :  { %696 = vmatprep.mubr.msk.f32.mxu0 %vm740_vm1, %v739_v14 }
  0xcb   :  { %v661_v15 = vpop.f32.mrf.mxu0 }
  0xcc   :  { %695 = vmatpush3.xpose.msk.msra.mxu0 %vm269_vm2, %v661_v15 }
  0xcd   :  { %v97_v16 = vpop.f32.mrf.mxu0  ;;  %v672_v17 = vpop.f32.mrf.mxu1 }
  0xce   :  { %685 = vmatpush3.xpose.msk.msra.mxu1 %vm269_vm2, %v97_v16 }
  0xcf   :  { %697 = vmatmul.mubr.msk.f32.vlgmr.msra.gmra.mxu0 %vm269_vm2, %v672_v17  ;;  %689 = vmatprep.subr.mxu1 %v739_v14  ;;  %v176_v18 = vpop.f32.mrf.mxu1 }
  0xd1   :  { %687 = vmatmul.mubr.msk.f32.vlgmr.msra.gmra.mxu1 %vm269_vm2, %v176_v18 }
  0xd2   :  { %691 = vmatprep.mubr.msk.f32.mxu1 %vm740_vm1, %v739_v14 }
  0xd4   :  { %v683_v19 = vpop.f32.mrf.mxu0 }
  0xd6   :  { %v255_v20 = vpop.f32.mrf.mxu0 }
  0xd7   :  { %690 = vmatpush3.msra.mxu1 %v255_v20 }
  0xd8   :  { %699 = vmatprep.subr.mxu1 %v739_v14 }
 0x18f   :  { %v506_v22 = vpop.f32.mrf.mxu0 }
 0x190   :  { %v510_v27 = vmul.f32 0.25, %v506_v22 }
 0x191   :  { %v342_v25 = vpop.f32.mrf.mxu1  ;;  %v698_v26 = vpop.f32.mrf.mxu0 }
 0x192   :  { %v346_v28 = vmul.f32 0.25, %v342_v25  ;;  %v511_v32 = vsel %vm268_vm3, %v510_v27, -1e+30 }
 0x193   :  { %v688_v29 = vpop.f32.mrf.mxu1  ;;  %v512_v33 = vsel %vm348_vm4, %v511_v32, -inf }
 0x194   :  { %v347_v30 = vsel %vm268_vm3, %v346_v28, -1e+30 }
 0x195   :  { %v349_v31 = vsel %vm348_vm4, %v347_v30, -inf }
 0x196   :  { %350 = vmax.xlane.f32.xlu0 %v349_v31 }
 0x19a   :  { %513 = vmax.xlane.f32.xlu0 %v512_v33 }
 0x21f   :  { %v351_v34 = vpop.xlane.xlu0 %350 }
 0x220   :  { %v352_v35 = vsub.f32 %v347_v30, %v351_v34 }
 0x222   :  { %v353_v36 = vmul.f32 1.442695, %v352_v35 }
 0x223   :  { %v514_v37 = vpop.xlane.xlu0 %513 }
 0x224   :  { %709 = vpow2.f32 %v353_v36  ;;  %v515_v38 = vsub.f32 %v511_v32, %v514_v37 }
 0x226   :  { %v516_v39 = vmul.f32 1.442695, %v515_v38 }
 0x228   :  { %711 = vpow2.f32 %v516_v39 }
 0x231   :  { %v710_v40 = vpop.eup %709 }
 0x232   :  { %v355_v41 = vsel %vm348_vm4, %v710_v40, 0.0 }
 0x233   :  { %356 = vadd.xlane.f32.xlu1 %v355_v41 }
 0x235   :  { %v712_v42 = vpop.eup %711 }
 0x236   :  { %v518_v43 = vsel %vm348_vm4, %v712_v42, 0.0 }
 0x237   :  { %519 = vadd.xlane.f32.xlu1 %v518_v43 }
 0x2bc   :  { %v357_v44 = vpop.xlane.xlu1 %356 }
 0x2bd   :  { %713 = vrcp.f32 %v357_v44 }
 0x2c0   :  { %v520_v45 = vpop.xlane.xlu1 %519 }
 0x2c1   :  { %715 = vrcp.f32 %v520_v45 }
 0x2ca   :  { %v714_v46 = vpop.eup %713 }
 0x2cb   :  { %v359_v47 = vmul.f32 %v714_v46, %v710_v40 }
 0x2cd   :  { %692 = vmatmul.mubr.msk.f32.vlgmr.msra.gmra.mxu1 %vm348_vm4, %v359_v47 }
 0x2ce   :  { %v716_v48 = vpop.eup %715  ;;  %700 = vmatpush3.msra.mxu1 %v683_v19  ;;  %701 = vmatprep.mubr.msk.f32.mxu1 %vm740_vm1, %v739_v14 }
 0x2cf   :  { %v522_v49 = vmul.f32 %v716_v48, %v712_v42 }
 0x2d1   :  { %702 = vmatmul.mubr.msk.f32.vlgmr.msra.gmra.mxu1 %vm348_vm4, %v522_v49 }
 0x38d   :  { %v429_v50 = vpop.f32.mrf.mxu1 }
 0x38e   :  { %433 = vst.msk [vmem:[#allocation2] sm:$0xff] %vm269_vm2, %v429_v50 }
 0x38f   :  { %v693_v51 = vpop.f32.mrf.mxu1 }
 0x391   :  { %v592_v52 = vpop.f32.mrf.mxu1 }
 0x392   :  { %596 = vst.msk [vmem:[#allocation2 + $0x8] sm:$0xff] %vm269_vm2, %v592_v52 }
 0x393   :  { %v703_v53 = vpop.f32.mrf.mxu1 }
 0x394   :  { %728 = shalt.err (!%p725_p4)
}
 0x395   :  { %s742_s16 = smov 128   ;;  %s743_s17 = smov 8  }
 0x396   :  { %608 = dma.vmem_to_hbm [thread:$0]  %s603_s14, 256, %s840_s4, [#allocation3], %s742_s16, %s742_s16, %s743_s17  }
 0x397   :  { %737 = dma.done.wait [#allocation3], 256  }
 0x398   :  { %738 = vsyncadd [#allocation3], 4294967040 }
 0x399   :  { %612 = vsyncpa [#allocation3], 1 }

</bundles_post_ra>
